<compile_context>
chip_gen: v6e
topology: v6e:2x2x1
jax: 0.10.0
libtpu: 0.0.40
codegen_flags: <defaults>
</compile_context>

<pallas_src>
import functools
import math

import jax
import jax.numpy as jnp
from jax.experimental import pallas as pl
from jax.experimental.pallas import tpu as pltpu


_VMEM_LIMIT = 48 * 1024 * 1024    # raised scoped-VMEM ceiling (< 64 MiB physical on v7x)
_VMEM_BUDGET = 36 * 1024 * 1024   # budget for double-buffered blocks when choosing tiles


def _round_up(x, m):
    return ((x + m - 1) // m) * m


def _col_plan(n):
    """Output-column tile and padded column count."""
    if n <= 512:
        return n, n                        # single full-dim block (always legal)
    for t in (256, 128):
        if n % t == 0:
            return t, n
    return 128, _round_up(n, 128)


def _row_plan(rows, k, tn, itemsize=4):
    """Row tile (multiple of 8) sized against the VMEM budget, plus padded row count."""
    rows8 = _round_up(rows, 8)
    tm = 512
    while tm > 8:
        need = 2 * itemsize * (tm * k + k * tn + 2 * tm * tn)   # double-buffered blocks
        if need <= _VMEM_BUDGET:
            break
        tm //= 2
    tm = min(tm, rows8)
    rows_pad = _round_up(rows, tm)
    return tm, rows_pad


def _seq_tile(s):
    if s <= 128:
        return s
    for t in (128, 64, 32, 16, 8):
        if s % t == 0:
            return t
    # TODO(synk): pad/mask ragged sequence lengths; fall back to one block.
    return s


def _pad2d(x, rows_pad, cols_pad):
    r, c = x.shape
    if r == rows_pad and c == cols_pad:
        return x
    return jnp.pad(x, ((0, rows_pad - r), (0, cols_pad - c)))


def _rope_tables(seq_len, head_dim, dtype=jnp.float32, base=10000.0):
    inv_freq = 1.0 / (base ** (jnp.arange(0, head_dim, 2, dtype=jnp.float32) / head_dim))
    t = jnp.arange(seq_len, dtype=jnp.float32)
    freqs = jnp.outer(t, inv_freq)                     # [S, D/2]
    return jnp.cos(freqs).astype(dtype), jnp.sin(freqs).astype(dtype)


# ----------------------------------------------------------------------------------------------
# Kernel 1: fused RMSNorm + matmul   (input_layernorm + QKV projection)
# ----------------------------------------------------------------------------------------------
def _rmsnorm_matmul_kernel(x_ref, nw_ref, w_ref, o_ref, *, eps):
    x = x_ref[...].astype(jnp.float32)                 # single f32 cast of the tile
    var = jnp.mean(x * x, axis=-1, keepdims=True)
    h = (x * jax.lax.rsqrt(var + eps)) * nw_ref[...].astype(jnp.float32)
    o_ref[...] = jnp.dot(h, w_ref[...].astype(jnp.float32),
                         preferred_element_type=jnp.float32).astype(o_ref.dtype)


def rmsnorm_matmul(x2d, norm_w, w, eps):
    """(rmsnorm(x) * norm_w) @ w  with x2d:[M,K], w:[K,N]."""
    M, K = x2d.shape
    _, N = w.shape
    tn, n_pad = _col_plan(N)
    tm, m_pad = _row_plan(M, K, tn)
    xp = _pad2d(x2d, m_pad, K)
    wp = _pad2d(w, K, n_pad)
    out_dtype = jnp.result_type(x2d.dtype, w.dtype)
    out = pl.pallas_call(
        functools.partial(_rmsnorm_matmul_kernel, eps=eps),
        out_shape=jax.ShapeDtypeStruct((m_pad, n_pad), out_dtype),
        grid_spec=pltpu.PrefetchScalarGridSpec(
            num_scalar_prefetch=0,
            grid=(m_pad // tm, n_pad // tn),
            in_specs=[
                pl.BlockSpec((tm, K), lambda i, j: (i, 0)),
                pl.BlockSpec((1, K), lambda i, j: (0, 0)),
                pl.BlockSpec((K, tn), lambda i, j: (0, j)),
            ],
            out_specs=pl.BlockSpec((tm, tn), lambda i, j: (i, j)),
        ),
        compiler_params=pltpu.CompilerParams(
            dimension_semantics=("parallel", "parallel"),
            vmem_limit_bytes=_VMEM_LIMIT,
        ),
    )(xp, norm_w.reshape(1, K), wp)
    return out[:M, :N]


# ----------------------------------------------------------------------------------------------
# Kernel 2: fused RMSNorm + gate/up projection + SwiGLU
# ----------------------------------------------------------------------------------------------
def _rmsnorm_swiglu_kernel(x_ref, nw_ref, wg_ref, wu_ref, o_ref, *, eps):
    x = x_ref[...].astype(jnp.float32)
    var = jnp.mean(x * x, axis=-1, keepdims=True)
    h = (x * jax.lax.rsqrt(var + eps)) * nw_ref[...].astype(jnp.float32)
    g = jnp.dot(h, wg_ref[...].astype(jnp.float32), preferred_element_type=jnp.float32)
    u = jnp.dot(h, wu_ref[...].astype(jnp.float32), preferred_element_type=jnp.float32)
    o_ref[...] = (g * jax.nn.sigmoid(g) * u).astype(o_ref.dtype)       # silu(g) * u


def rmsnorm_swiglu(x2d, norm_w, wg, wu, eps):
    M, K = x2d.shape
    _, N = wg.shape
    tn, n_pad = _col_plan(N)
    tm, m_pad = _row_plan(M, K, 2 * tn)                # two weight blocks resident
    xp = _pad2d(x2d, m_pad, K)
    wgp = _pad2d(wg, K, n_pad)
    wup = _pad2d(wu, K, n_pad)
    out_dtype = jnp.result_type(x2d.dtype, wg.dtype)
    out = pl.pallas_call(
        functools.partial(_rmsnorm_swiglu_kernel, eps=eps),
        out_shape=jax.ShapeDtypeStruct((m_pad, n_pad), out_dtype),
        grid_spec=pltpu.PrefetchScalarGridSpec(
            num_scalar_prefetch=0,
            grid=(m_pad // tm, n_pad // tn),
            in_specs=[
                pl.BlockSpec((tm, K), lambda i, j: (i, 0)),
                pl.BlockSpec((1, K), lambda i, j: (0, 0)),
                pl.BlockSpec((K, tn), lambda i, j: (0, j)),
                pl.BlockSpec((K, tn), lambda i, j: (0, j)),
            ],
            out_specs=pl.BlockSpec((tm, tn), lambda i, j: (i, j)),
        ),
        compiler_params=pltpu.CompilerParams(
            dimension_semantics=("parallel", "parallel"),
            vmem_limit_bytes=_VMEM_LIMIT,
        ),
    )(xp, norm_w.reshape(1, K), wgp, wup)
    return out[:M, :N]


# ----------------------------------------------------------------------------------------------
# Kernel 3: matmul + residual add   (o_proj / down_proj)
# ----------------------------------------------------------------------------------------------
def _matmul_residual_kernel(a_ref, w_ref, r_ref, o_ref):
    acc = jnp.dot(a_ref[...].astype(jnp.float32), w_ref[...].astype(jnp.float32),
                  preferred_element_type=jnp.float32)
    o_ref[...] = (acc + r_ref[...].astype(jnp.float32)).astype(o_ref.dtype)


def matmul_residual(a2d, w, res2d):
    M, K = a2d.shape
    _, N = w.shape
    tn, n_pad = _col_plan(N)
    tm, m_pad = _row_plan(M, K, tn)
    ap = _pad2d(a2d, m_pad, K)
    wp = _pad2d(w, K, n_pad)
    rp = _pad2d(res2d, m_pad, n_pad)
    out_dtype = jnp.result_type(a2d.dtype, w.dtype, res2d.dtype)
    out = pl.pallas_call(
        _matmul_residual_kernel,
        out_shape=jax.ShapeDtypeStruct((m_pad, n_pad), out_dtype),
        grid_spec=pltpu.PrefetchScalarGridSpec(
            num_scalar_prefetch=0,
            grid=(m_pad // tm, n_pad // tn),
            in_specs=[
                pl.BlockSpec((tm, K), lambda i, j: (i, 0)),
                pl.BlockSpec((K, tn), lambda i, j: (0, j)),
                pl.BlockSpec((tm, tn), lambda i, j: (i, j)),
            ],
            out_specs=pl.BlockSpec((tm, tn), lambda i, j: (i, j)),
        ),
        compiler_params=pltpu.CompilerParams(
            dimension_semantics=("parallel", "parallel"),
            vmem_limit_bytes=_VMEM_LIMIT,
        ),
    )(ap, wp, rp)
    return out[:M, :N]


# ----------------------------------------------------------------------------------------------
# Kernel 4: RoPE + causal flash attention (online softmax)
# ----------------------------------------------------------------------------------------------
def _flash_rope_kernel(qa_ref, qb_ref, ka_ref, kb_ref, v_ref,
                       cq_ref, sq_ref, ck_ref, sk_ref,
                       o_ref, m_sc, l_sc, acc_sc, *, scale, tq, tk):
    qi = pl.program_id(1)
    ki = pl.program_id(2)

    @pl.when(ki == 0)
    def _init():
        m_sc[...] = jnp.full(m_sc.shape, -jnp.inf, dtype=m_sc.dtype)
        l_sc[...] = jnp.zeros(l_sc.shape, dtype=l_sc.dtype)
        acc_sc[...] = jnp.zeros(acc_sc.shape, dtype=acc_sc.dtype)

    # causal: with tq == tk, block (qi, ki) is fully masked iff ki > qi -> skip it
    @pl.when(ki <= qi)
    def _update():
        qa = qa_ref[...][0].astype(jnp.float32)        # (tq, D/2)
        qb = qb_ref[...][0].astype(jnp.float32)
        ka = ka_ref[...][0].astype(jnp.float32)        # (tk, D/2)
        kb = kb_ref[...][0].astype(jnp.float32)
        v = v_ref[...][0].astype(jnp.float32)          # (tk, D)
        cq, sq = cq_ref[...], sq_ref[...]              # (tq, D/2)
        ck, sk = ck_ref[...], sk_ref[...]              # (tk, D/2)
        # Rotary embedding (interleaved=False / NeoX): halves rotated in place.
        qr1 = qa * cq - qb * sq
        qr2 = qa * sq + qb * cq
        kr1 = ka * ck - kb * sk
        kr2 = ka * sk + kb * ck
        dn = (((1,), (1,)), ((), ()))                  # contract over head-dim halves
        s = (jax.lax.dot_general(qr1, kr1, dn, preferred_element_type=jnp.float32)
             + jax.lax.dot_general(qr2, kr2, dn, preferred_element_type=jnp.float32)) * scale
        rows = qi * tq + jax.lax.broadcasted_iota(jnp.int32, (tq, tk), 0)
        cols = ki * tk + jax.lax.broadcasted_iota(jnp.int32, (tq, tk), 1)
        s = jnp.where(cols <= rows, s, -jnp.inf)
        m_prev = m_sc[...]
        m_new = jnp.maximum(m_prev, s.max(axis=-1, keepdims=True))
        alpha = jnp.exp(m_prev - m_new)
        p = jnp.exp(s - m_new)
        l_sc[...] = alpha * l_sc[...] + p.sum(axis=-1, keepdims=True)
        acc_sc[...] = alpha * acc_sc[...] + jnp.dot(p, v, preferred_element_type=jnp.float32)
        m_sc[...] = m_new

    @pl.when(ki == pl.num_programs(2) - 1)
    def _finalize():
        out = acc_sc[...] * pl.reciprocal(l_sc[...], approx=True)
        o_ref[...] = out.astype(o_ref.dtype).reshape(o_ref.shape)


def flash_attention_rope_causal(q, k, v, cos, sin, scale):
    """q,k,v: [B*H, S, D]; cos,sin: [S, D//2]; causal attention with NeoX RoPE on q,k."""
    BH, S, D = q.shape
    D2 = D // 2
    tq = _seq_tile(S)
    tk = tq
    qa, qb = q[..., :D2], q[..., D2:]
    ka, kb = k[..., :D2], k[..., D2:]

    kern = functools.partial(_flash_rope_kernel, scale=scale, tq=tq, tk=tk)
    out = pl.pallas_call(
        kern,
        out_shape=jax.ShapeDtypeStruct((BH, S, D), q.dtype),
        grid_spec=pltpu.PrefetchScalarGridSpec(
            num_scalar_prefetch=0,
            grid=(BH, S // tq, S // tk),
            in_specs=[
                pl.BlockSpec((1, tq, D2), lambda b, i, j: (b, i, 0)),
                pl.BlockSpec((1, tq, D2), lambda b, i, j: (b, i, 0)),
                pl.BlockSpec((1, tk, D2), lambda b, i, j: (b, j, 0)),
                pl.BlockSpec((1, tk, D2), lambda b, i, j: (b, j, 0)),
                pl.BlockSpec((1, tk, D), lambda b, i, j: (b, j, 0)),
                pl.BlockSpec((tq, D2), lambda b, i, j: (i, 0)),
                pl.BlockSpec((tq, D2), lambda b, i, j: (i, 0)),
                pl.BlockSpec((tk, D2), lambda b, i, j: (j, 0)),
                pl.BlockSpec((tk, D2), lambda b, i, j: (j, 0)),
            ],
            out_specs=pl.BlockSpec((1, tq, D), lambda b, i, j: (b, i, 0)),
            scratch_shapes=[
                pltpu.VMEM((tq, 1), jnp.float32),
                pltpu.VMEM((tq, 1), jnp.float32),
                pltpu.VMEM((tq, D), jnp.float32),
            ],
        ),
        compiler_params=pltpu.CompilerParams(
            dimension_semantics=("parallel", "parallel", "arbitrary"),
            vmem_limit_bytes=_VMEM_LIMIT,
        ),
    )(qa, qb, ka, kb, v, cos, sin, cos, sin)
    return out


# ----------------------------------------------------------------------------------------------
# GPTBlock forward (default path: causal mask, no KV cache)
# ----------------------------------------------------------------------------------------------
def gpt_block_forward(x, params, *, num_heads, eps=1e-6):
    B, S, H = x.shape
    D = H // num_heads
    rows = B * S
    x2d = x.reshape(rows, H)

    # attention sub-block: RMSNorm -> QKV proj -> RoPE -> causal flash attn -> o_proj -> +residual
    wqkv = jnp.concatenate([params["wq"], params["wk"], params["wv"]], axis=1)   # [H, 3H]
    qkv = rmsnorm_matmul(x2d, params["ln1_w"], wqkv, eps)                        # [rows, 3H]
    qkv = qkv.reshape(B, S, 3, num_heads, D)
    q = qkv[:, :, 0].transpose(0, 2, 1, 3).reshape(B * num_heads, S, D)
    k = qkv[:, :, 1].transpose(0, 2, 1, 3).reshape(B * num_heads, S, D)
    v = qkv[:, :, 2].transpose(0, 2, 1, 3).reshape(B * num_heads, S, D)
    cos, sin = _rope_tables(S, D, dtype=jnp.float32)
    attn = flash_attention_rope_causal(q, k, v, cos, sin, scale=1.0 / math.sqrt(D))
    attn2d = attn.reshape(B, num_heads, S, D).transpose(0, 2, 1, 3).reshape(rows, H)
    x2d = matmul_residual(attn2d, params["wo"], x2d)

    # MLP sub-block: RMSNorm -> gate/up -> SwiGLU -> down_proj -> +residual
    act = rmsnorm_swiglu(x2d, params["ln2_w"], params["wg"], params["wu"], eps)
    x2d = matmul_residual(act, params["wd"], x2d)
    return x2d.reshape(B, S, H)


# ----------------------------------------------------------------------------------------------
# Pure-JAX reference (for verification)
# ----------------------------------------------------------------------------------------------
def gpt_block_reference(x, params, *, num_heads, eps=1e-6):
    B, S, H = x.shape
    D = H // num_heads
    D2 = D // 2

    def rms(h, w):
        hf = h.astype(jnp.float32)
        var = jnp.mean(hf * hf, axis=-1, keepdims=True)
        return w.astype(jnp.float32) * (hf * jax.lax.rsqrt(var + eps))

    cos, sin = _rope_tables(S, D)

    def rope(t):                                   # t: [B, S, nh, D]
        c = cos[None, :, None, :]
        s = sin[None, :, None, :]
        t1, t2 = t[..., :D2], t[..., D2:]
        return jnp.concatenate([t1 * c - t2 * s, t1 * s + t2 * c], axis=-1)

    h = rms(x, params["ln1_w"])
    q = (h @ params["wq"]).reshape(B, S, num_heads, D)
    k = (h @ params["wk"]).reshape(B, S, num_heads, D)
    v = (h @ params["wv"]).reshape(B, S, num_heads, D)
    q, k = rope(q), rope(k)
    scores = jnp.einsum("bqhd,bkhd->bhqk", q, k) / math.sqrt(D)
    causal = jnp.tril(jnp.ones((S, S), dtype=bool))
    scores = jnp.where(causal[None, None], scores, -jnp.inf)
    p = jax.nn.softmax(scores, axis=-1)
    a = jnp.einsum("bhqk,bkhd->bqhd", p, v).reshape(B, S, H)
    x = x + a @ params["wo"]

    h = rms(x, params["ln2_w"])
    g = h @ params["wg"]
    u = h @ params["wu"]
    x = x + (jax.nn.silu(g) * u) @ params["wd"]
    return x


if __name__ == "__main__":
    batch, seq, hidden, num_heads, intermediate = 2, 8, 32, 4, 64
    eps = 1e-6
    key = jax.random.PRNGKey(0)
    ks = jax.random.split(key, 8)

    def init_w(k, shape, fan_in):
        return jax.random.normal(k, shape, dtype=jnp.float32) / math.sqrt(fan_in)

    params = {
        "ln1_w": jnp.ones((hidden,), jnp.float32),       # nn.Parameter(torch.ones(hidden_size))
        "ln2_w": jnp.ones((hidden,), jnp.float32),
        "wq": init_w(ks[0], (hidden, hidden), hidden),   # stored as [in, out] (= W.T of nn.Linear)
        "wk": init_w(ks[1], (hidden, hidden), hidden),
        "wv": init_w(ks[2], (hidden, hidden), hidden),
        "wo": init_w(ks[3], (hidden, hidden), hidden),
        "wg": init_w(ks[4], (hidden, intermediate), hidden),
        "wu": init_w(ks[5], (hidden, intermediate), hidden),
        "wd": init_w(ks[6], (intermediate, hidden), intermediate),
    }
    x = jax.random.normal(ks[7], (batch, seq, hidden), dtype=jnp.float32)

    out = gpt_block_forward(x, params, num_heads=num_heads, eps=eps)
    out = jax.block_until_ready(out)

    with jax.default_matmul_precision("highest"):
        ref = gpt_block_reference(x, params, num_heads=num_heads, eps=eps)
    assert out.shape == x.shape, (out.shape, x.shape)
    err = float(jnp.max(jnp.abs(out - ref)))
    assert err < 2e-2, err
    print("KERNEL_OK")
</pallas_src>

<mosaic_0001>
module attributes {stable_mosaic.version = 11 : i64} {
  func.func @_rmsnorm_matmul_kernel(%arg0: i32, %arg1: i32, %arg2: memref<16x32xf32, #tpu.memory_space<vmem>>, %arg3: memref<1x32xf32, #tpu.memory_space<vmem>>, %arg4: memref<32x96xf32, #tpu.memory_space<vmem>>, %arg5: memref<16x96xf32, #tpu.memory_space<vmem>>) attributes {dimension_semantics = [#tpu.dimension_semantics<parallel>, #tpu.dimension_semantics<parallel>], iteration_bounds = array<i64: 1, 1>, scalar_prefetch = 0 : i64, scratch_operands = 0 : i64, tpu.core_type = #tpu.core_type<tc>, window_params = [{transform_indices = @transform_0, window_bounds = array<i64: 16, 32>}, {pipeline_mode = #tpu.pipeline_mode<synchronous>, transform_indices = @transform_1, window_bounds = array<i64: 1, 32>}, {transform_indices = @transform_2, window_bounds = array<i64: 32, 96>}, {transform_indices = @transform_3, window_bounds = array<i64: 16, 96>}]} {
    %c0 = arith.constant 0 : index
    %c0_0 = arith.constant 0 : index
    %0 = vector.load %arg2[%c0, %c0_0] : memref<16x32xf32, #tpu.memory_space<vmem>>, vector<16x32xf32>
    %1 = arith.mulf %0, %0 : vector<16x32xf32>
    %cst = arith.constant dense<0.000000e+00> : vector<16xf32>
    %2 = vector.multi_reduction <add>, %1, %cst [1] : vector<16x32xf32> to vector<16xf32>
    %3 = vector.shape_cast %2 : vector<16xf32> to vector<16x1xf32>
    %cst_1 = arith.constant 3.200000e+01 : f32
    %4 = vector.broadcast %cst_1 : f32 to vector<16x1xf32>
    %5 = arith.divf %3, %4 : vector<16x1xf32>
    %cst_2 = arith.constant 9.99999997E-7 : f32
    %6 = vector.broadcast %cst_2 : f32 to vector<16x1xf32>
    %7 = arith.addf %5, %6 : vector<16x1xf32>
    %8 = math.rsqrt %7 : vector<16x1xf32>
    %9 = vector.broadcast %8 : vector<16x1xf32> to vector<16x32xf32>
    %10 = arith.mulf %0, %9 : vector<16x32xf32>
    %c0_3 = arith.constant 0 : index
    %c0_4 = arith.constant 0 : index
    %11 = vector.load %arg3[%c0_3, %c0_4] : memref<1x32xf32, #tpu.memory_space<vmem>>, vector<1x32xf32>
    %12 = vector.broadcast %11 : vector<1x32xf32> to vector<16x32xf32>
    %13 = arith.mulf %10, %12 : vector<16x32xf32>
    %c0_5 = arith.constant 0 : index
    %c0_6 = arith.constant 0 : index
    %14 = vector.load %arg4[%c0_5, %c0_6] : memref<32x96xf32, #tpu.memory_space<vmem>>, vector<32x96xf32>
    %cst_7 = arith.constant dense<0.000000e+00> : vector<16x96xf32>
    %15 = tpu.matmul %13, %14, %cst_7 {dimension_numbers = #tpu.dot_dimension_numbers<[1], [0], [0], [1], [0, 0, 1, 1], [], []>} : vector<16x32xf32>, vector<32x96xf32>, vector<16x96xf32> -> vector<16x96xf32>
    %c0_8 = arith.constant 0 : index
    %c0_9 = arith.constant 0 : index
    %16 = vector.load %arg5[%c0_8, %c0_9] : memref<16x96xf32, #tpu.memory_space<vmem>>, vector<16x96xf32>
    tpu.vector_store %arg5[%c0_8, %c0_9], %15 {strides = array<i32>} : memref<16x96xf32, #tpu.memory_space<vmem>>, vector<16x96xf32>,
    return
  }
  func.func @transform_0(%arg0: i32, %arg1: i32) -> (i32, i32) {
    %c0_i32 = arith.constant 0 : i32
    %c0_i32_0 = arith.constant 0 : i32
    return %arg0, %c0_i32 : i32, i32
  }
  func.func @transform_1(%arg0: i32, %arg1: i32) -> (i32, i32) {
    %c0_i32 = arith.constant 0 : i32
    %c0_i32_0 = arith.constant 0 : i32
    %c0_i32_1 = arith.constant 0 : i32
    return %c0_i32, %c0_i32_0 : i32, i32
  }
  func.func @transform_2(%arg0: i32, %arg1: i32) -> (i32, i32) {
    %c0_i32 = arith.constant 0 : i32
    %c0_i32_0 = arith.constant 0 : i32
    return %c0_i32, %arg1 : i32, i32
  }
  func.func @transform_3(%arg0: i32, %arg1: i32) -> (i32, i32) {
    %c0_i32 = arith.constant 0 : i32
    return %arg0, %arg1 : i32, i32
  }
}

</mosaic_0001>

<bundles_post_ra>
// kernel: tpu_custom_call.1
= control target key start
LH: loop header
LB: loop body
LE: loop exit
PB: predicated region body
PF: predicated region fallthrough
CT: control target
= control target key end

     0   :  { %8 = vsyncpa [#allocation3], 0  ;;  %s323_s0 = inlined_call_operand.hbm [shape: f32[16,32], index: 0, kind: input, shape index: {}]   ;;  %s324_s1 = inlined_call_operand.vmem [shape: f32[1,32], index: 1, kind: input, shape index: {}]   ;;  %s325_s2 = inlined_call_operand.hbm [shape: f32[32,96], index: 2, kind: input, shape index: {}]   ;;  %s326_s3 = inlined_call_operand.hbm [shape: f32[16,96], index: 3, kind: output, shape index: {}]  }
   0x1   :  { %9 = vsyncpa [#allocation6], 0 }
   0x2   :  { %10 = vsyncpa [#allocation4], 0  ;;  %s273_s12 = smov [#allocation2]  }
   0x3   :  { %s16_s13 = sshll.u32 %s273_s12, 4  ;;  %s17_s13 = int_to_ptr.vmem [resolvable:$true] %s16_s13 }
   0x4   :  { %s215_s14 = scalar_lea.vmem %s17_s13, 256  ;;  %p220_p1 = scmp.lt.s32.totalorder %s17_s13, %s17_s13 }
   0x5   :  { %p216_p0 = scmp.ne.s32.totalorder %s17_s13, %s215_s14  ;;  %p221_p2 = scmp.lt.s32.totalorder %s215_s14, %s215_s14 }
   0x7   :  { %p222_p3 = por %p221_p2, %p220_p1 }
   0x9   :  { %p223_p4 = pnand %p222_p3, %p216_p0 }
   0xb   :  { %226 = shalt.err (!%p223_p4)
}
   0xc   :  { %s274_s15 = smov 128   ;;  %s275_s16 = smov 8  }
   0xd   :  { %22 = dma.hbm_to_vmem [thread:$0]  %s323_s0, 256, %s17_s13, [#allocation3], %s274_s15, %s274_s15, %s275_s16  }
   0xe   :  { %s276_s19 = smov [#allocation5]  }
   0xf   :  { %s30_s20 = sshll.u32 %s276_s19, 4  ;;  %s31_s20 = int_to_ptr.vmem [resolvable:$true] %s30_s20 }
  0x10   :  { %s235_s21 = scalar_lea.vmem %s31_s20, 512  ;;  %p240_p6 = scmp.lt.s32.totalorder %s31_s20, %s31_s20 }
  0x11   :  { %p236_p5 = scmp.ne.s32.totalorder %s31_s20, %s235_s21  ;;  %p241_p7 = scmp.lt.s32.totalorder %s235_s21, %s235_s21 }
  0x13   :  { %p242_p8 = por %p241_p7, %p240_p6 }
  0x15   :  { %p243_p9 = pnand %p242_p8, %p236_p5 }
  0x17   :  { %246 = shalt.err (!%p243_p9)
}
  0x18   :  { %36 = dma.hbm_to_vmem [thread:$0]  %s325_s2, 512, %s31_s20, [#allocation6], %s274_s15, %s274_s15, %s275_s16  }
  0x19   :  { %267 = dma.done.wait [#allocation3], 256  }
  0x1a   :  { %268 = vsyncadd [#allocation3], 4294967040 }
  0x1b   :  { %269 = dma.done.wait [#allocation6], 512  }
  0x1c   :  { %270 = vsyncadd [#allocation6], 4294966784  ;;  %v43_v0 = vld [vmem:[#allocation2] sm:$0xff]  ;;  %vm47_vm0 = vcmask 261120   ;;  %v44_v1 = vld [vmem:[#allocation2 + $0x8] sm:$0xff]  ;;  %vm157_vm1 = vcmask 785408  }
  0x1d   :  { %v45_v2 = vmul.f32 %v43_v0, %v43_v0  ;;  %v46_v3 = vmul.f32 %v44_v1, %v44_v1  ;;  %v75_v6 = vld [vmem:[#allocation5 + $0x18] sm:$0xff]  ;;  %v74_v7 = vld [vmem:[#allocation5 + $0x10] sm:$0xff]  ;;  %v73_v8 = vld [vmem:[#allocation5 + $0x8] sm:$0xff]  ;;  %s277_s24 = smov [#allocation7]  }
  0x1e   :  { %187 = vmatprep.subr.mxu0 %v75_v6  ;;  %v72_v9 = vld [vmem:[#allocation5] sm:$0xff]  ;;  %v178_v17 = vld [vmem:[%s324_s1] ss:$0 sm:$0xff]  ;;  %s165_s25 = sshll.u32 %s277_s24, 4  ;;  %s166_s25 = int_to_ptr.vmem [resolvable:$true] %s165_s25 }
  0x1f   :  { %v48_v4 = vsel %vm47_vm0, %v45_v2, 0.0  ;;  %v51_v5 = vsel %vm47_vm0, %v46_v3, 0.0  ;;  %188 = vmatpush3.msra.mxu0 %v75_v6  ;;  %s247_s26 = scalar_lea.vmem %s166_s25, 256  ;;  %p252_p11 = scmp.lt.s32.totalorder %s166_s25, %s166_s25 }
  0x20   :  { %49 = vadd.xlane.f32.xlu0 %v48_v4  ;;  %189 = vmatprep.subr.mxu0 %v74_v7  ;;  %p248_p10 = scmp.ne.s32.totalorder %s166_s25, %s247_s26  ;;  %p253_p12 = scmp.lt.s32.totalorder %s247_s26, %s247_s26 }
  0x21   :  { %190 = vmatpush3.msra.mxu0 %v74_v7 }
  0x22   :  { %191 = vmatprep.subr.mxu0 %v73_v8  ;;  %p254_p13 = por %p253_p12, %p252_p11 }
  0x23   :  { %192 = vmatpush3.msra.mxu0 %v73_v8 }
  0x24   :  { %52 = vadd.xlane.f32.xlu0 %v51_v5  ;;  %193 = vmatprep.subr.mxu0 %v72_v9  ;;  %p255_p0 = pnand %p254_p13, %p248_p10 }
  0x25   :  { %194 = vmatpush3.msra.mxu0 %v72_v9 }
  0xa9   :  { %v50_v10 = vpop.xlane.xlu0 %49 }
  0xaa   :  { %v55_v11 = vmul.f32 0.03125, %v50_v10 }
  0xac   :  { %v57_v12 = vadd.f32 1e-06, %v55_v11 }
  0xad   :  { %v53_v13 = vpop.xlane.xlu0 %52 }
  0xae   :  { %203 = vrsqrt.f32 %v57_v12  ;;  %v56_v14 = vmul.f32 0.03125, %v53_v13 }
  0xb0   :  { %v58_v15 = vadd.f32 1e-06, %v56_v14 }
  0xb2   :  { %205 = vrsqrt.f32 %v58_v15 }
  0xbb   :  { %v204_v16 = vpop.eup %203 }
  0xbc   :  { %v61_v18 = vmul.f32 %v204_v16, %v43_v0 }
  0xbe   :  { %v70_v19 = vmul.f32 %v178_v17, %v61_v18 }
  0xbf   :  { %v206_v20 = vpop.eup %205 }
  0xc0   :  { %v62_v21 = vmul.f32 %v206_v20, %v44_v1  ;;  %195 = vmatprep.mubr.msk.f32.mxu0 %vm47_vm0, %v70_v19 }
  0xc2   :  { %v71_v22 = vmul.f32 %v178_v17, %v62_v21 }
  0xc4   :  { %196 = vmatmul.mubr.msk.f32.vlgmr.msra.gmra.mxu0 %vm47_vm0, %v71_v22 }
 0x184   :  { %v197_v23 = vpop.f32.mrf.mxu0 }
 0x185   :  { %159 = vst.msk [vmem:[#allocation7 + $0x8] sm:$0xff] %vm157_vm1, %v197_v23 }
 0x186   :  { %v148_v24 = vpop.f32.mrf.mxu0 }
 0x187   :  { %158 = vst.msk [vmem:[#allocation7] sm:$0xff] %vm157_vm1, %v148_v24 }
 0x188   :  { %258 = shalt.err (!%p255_p0)
}
 0x189   :  { %171 = dma.vmem_to_hbm [thread:$0]  %s166_s25, 256, %s326_s3, [#allocation4], %s274_s15, %s274_s15, %s275_s16  }
 0x18a   :  { %271 = dma.done.wait [#allocation4], 256  }
 0x18b   :  { %272 = vsyncadd [#allocation4], 4294967040 }
 0x18c   :  { %175 = vsyncpa [#allocation3], 1 }
 0x18d   :  { %176 = vsyncpa [#allocation6], 1 }
 0x18e   :  { %177 = vsyncpa [#allocation4], 1 }

</bundles_post_ra>
